<compile_context>
chip_gen: v5e
topology: v5e:2x2
jax: 0.10.0
libtpu: 0.0.40
codegen_flags: <defaults>
</compile_context>

<pallas_src>
import functools

import jax
import jax.numpy as jnp
from jax.experimental import pallas as pl
from jax.experimental.pallas import tpu as pltpu

# Set to jnp.bfloat16 on v6e/v7x to halve MXU pass count per dot.  Kept f32 by default
# so the forward matches the f32 PyTorch reference; accumulation and all softmax/log
# math stay f32 either way.
MXU_DTYPE = jnp.float32


def _dot(a, b):
    return jnp.dot(a.astype(MXU_DTYPE), b.astype(MXU_DTYPE),
                   preferred_element_type=jnp.float32)


# ---------------------------------------------------------------------------
# Fused kernel.
# PyTorch nn.LSTM gate order is (i, f, g, o); weights are passed pre-transposed so the
# kernel only does row-vector @ matrix products.
# ---------------------------------------------------------------------------
def _fused_kernel(ptrow_ref,                       # SMEM (1,) int32: row of Mt used as pt
                  x_ref, h0_ref, c0_ref,           # (seq,in), (1,H), (1,H)
                  wih_ref, whh_ref, b_ref,         # (in,4H), (H,4H), (1,4H)
                  wm_ref, w1t_ref, vrow_ref,       # (H,H), (H,H), (1,H)
                  wgt_ref, wvt_ref, bv_ref,        # (3H,H), (H,cw), (1,cw)
                  yt_ref,                          # out (1,cw)
                  mt_ref):                         # VMEM scratch (cw,H): last cw h-states
    seq = x_ref.shape[0]
    H = h0_ref.shape[1]
    cw = yt_ref.shape[1]

    # ---- LSTM --------------------------------------------------------------
    # Hoisted input projection (bias folded in): one MXU pass outside the serial loop.
    xw = _dot(x_ref[...], wih_ref[...]) + b_ref[...]                     # (seq, 4H)
    whh = whh_ref[...]

    h = h0_ref[...]
    c = c0_ref[...]
    # seq is static and small: fully unrolled so the scheduler can interleave steps.
    for t in range(seq):
        gates = xw[t:t + 1, :] + _dot(h, whh)                            # (1, 4H)
        sig = jax.nn.sigmoid(gates)                                      # full-width EUP
        tah = jnp.tanh(gates)                                            # full-width EUP
        i = sig[:, 0:H]
        f = sig[:, H:2 * H]
        o = sig[:, 3 * H:4 * H]
        g = tah[:, 2 * H:3 * H]
        c = f * c + i * g
        h = o * jnp.tanh(c)
        if t >= seq - cw:                   # keep only the last `cw` hidden states
            mt_ref[pl.ds(t - (seq - cw), 1), :] = h

    hn = h                                                               # (1, H)
    mt = mt_ref[...]                                                     # (cw, H)
    pt = mt_ref[pl.ds(ptrow_ref[0], 1), :]                               # (1, H) dynamic row

    # ---- Context attention -------------------------------------------------
    lin = _dot(hn, w1t_ref[...])                                         # (1, H)
    pre = jnp.tanh(_dot(mt, wm_ref[...]) + lin)                          # (cw, H)
    # scores = pre @ V as VPU mul + lane reduce (avoid an N=1 MXU matmul).
    scores = jnp.sum(pre * vrow_ref[...], axis=1, keepdims=True)         # (cw, 1)
    smax = jnp.max(scores, axis=0, keepdims=True)
    sh = scores - smax
    alphat = sh - jnp.log(jnp.sum(jnp.exp(sh), axis=0, keepdims=True))   # log_softmax (cw,1)
    # Faithful to the reference: the *log*-probabilities weight Mt (ct = log_softmax @ Mt).
    ct = jnp.sum(alphat * mt, axis=0, keepdims=True)                     # (1, H)

    # ---- Parent attention ----------------------------------------------------
    hcp = jnp.concatenate([hn, ct, pt], axis=1)                          # (1, 3H)
    gt = jnp.tanh(_dot(hcp, wgt_ref[...]))                               # single packed dot
    logits = _dot(gt, wvt_ref[...]) + bv_ref[...]                        # (1, cw)
    lmax = jnp.max(logits, axis=1, keepdims=True)
    ls = logits - lmax
    yt_ref[...] = ls - jnp.log(jnp.sum(jnp.exp(ls), axis=1, keepdims=True))


def fused_forward(pt_row, x, h0, c0, params, context_window):
    H = h0.shape[1]
    vmem = pl.BlockSpec(memory_space=pltpu.MemorySpace.VMEM)
    smem = pl.BlockSpec(memory_space=pltpu.MemorySpace.SMEM)
    return pl.pallas_call(
        _fused_kernel,
        out_shape=jax.ShapeDtypeStruct((1, context_window), jnp.float32),
        in_specs=[smem] + [vmem] * 12,
        out_specs=vmem,
        scratch_shapes=[pltpu.VMEM((context_window, H), jnp.float32)],
    )(pt_row, x, h0, c0,
      params["w_ih_t"], params["w_hh_t"], params["b_lstm"],
      params["wm"], params["w1_t"], params["v_row"],
      params["wg_t"], params["wv_t"], params["bv"])


# ---------------------------------------------------------------------------
# Full forward pass (embedding gather / concat is plain-JAX glue).
# ---------------------------------------------------------------------------
@functools.partial(jax.jit, static_argnames=("context_window",))
def main_model_forward(params, type_ids, value_ids, h0, c0, parent, context_window):
    emb_t = params["type_emb"][type_ids]                  # (seq, type_dim)
    emb_v = params["value_emb"][value_ids]                # (seq, value_dim)
    x = jnp.concatenate([emb_v, emb_t], axis=1).astype(jnp.float32)
    # TODO(synk): nn.Dropout is modeled as identity (eval-mode semantics).
    # In PyTorch the LSTM runs twice (prefix, then last `cw` steps) carrying state —
    # equivalent to one pass over the full sequence; the fused kernel does exactly that.
    # output[-parent-1] of the (cw,1,H) second-call lstm_out  ->  row cw-1-parent of Mt.
    pt_row = (context_window - 1 - jnp.asarray(parent, jnp.int32)).reshape(1)
    return fused_forward(pt_row, x, h0, c0, params, context_window)


# ---------------------------------------------------------------------------
# Deterministic parameter construction (mirrors the PyTorch __init__ shapes).
# ---------------------------------------------------------------------------
def init_params(key, vocab_value, value_dim, vocab_type, type_dim, hidden, cw):
    ks = jax.random.split(key, 8)
    in_dim = value_dim + type_dim
    f32 = jnp.float32

    value_emb = jax.random.normal(ks[0], (vocab_value, value_dim), f32)
    type_emb = jax.random.normal(ks[1], (vocab_type, type_dim), f32)

    # nn.LSTM(in_dim, hidden): weight_ih (4H, in), weight_hh (4H, H), two biases.
    w_ih = 0.1 * jax.random.normal(ks[2], (4 * hidden, in_dim), f32)
    w_hh = 0.1 * jax.random.normal(ks[3], (4 * hidden, hidden), f32)
    b_ih = 0.1 * jax.random.normal(ks[4], (4 * hidden,), f32)
    b_hh = 0.1 * jax.random.normal(ks[5], (4 * hidden,), f32)

    # Context_atten: Wm = ones, V = ones (as in the PyTorch __init__), linear1 (no bias).
    wm = jnp.ones((hidden, hidden), f32)
    v = jnp.ones((hidden, 1), f32)
    w1 = 0.1 * jax.random.normal(ks[6], (hidden, hidden), f32)       # linear1.weight

    # Parent_atten: Wg_linear (H, 3H) no bias; Wv_linear (cw, H) with bias.
    wg = 0.1 * jax.random.normal(ks[7], (hidden, 3 * hidden), f32)
    wv = 0.1 * jax.random.normal(jax.random.fold_in(key, 99), (cw, hidden), f32)
    bv = 0.01 * jnp.arange(cw, dtype=f32)

    return {
        "value_emb": value_emb,
        "type_emb": type_emb,
        "w_ih_t": w_ih.T,                       # (in_dim, 4H)
        "w_hh_t": w_hh.T,                       # (H, 4H)
        "b_lstm": (b_ih + b_hh)[None, :],       # (1, 4H)
        "wm": wm,                               # (H, H)
        "w1_t": w1.T,                           # (H, H)
        "v_row": v.T,                           # (1, H)
        "wg_t": wg.T,                           # (3H, H)  packed [Wg_h; Wg_c; Wg_p]
        "wv_t": wv.T,                           # (H, cw)
        "bv": bv[None, :],                      # (1, cw)
    }


if __name__ == "__main__":
    # Small shapes consistent with the module.
    vocab_value, value_dim = 50, 16
    vocab_type, type_dim = 40, 16
    hidden_dim = 32
    context_window = 4
    seq_len = 8
    parent = 1

    key = jax.random.PRNGKey(0)
    pkey, tkey, vkey = jax.random.split(key, 3)

    params = init_params(pkey, vocab_value, value_dim, vocab_type, type_dim,
                         hidden_dim, context_window)

    type_ids = jax.random.randint(tkey, (seq_len,), 0, vocab_type, dtype=jnp.int32)
    value_ids = jax.random.randint(vkey, (seq_len,), 0, vocab_value, dtype=jnp.int32)

    # initHidden(): zeros(1, batch, hidden) — batch = 1, stored as (1, H) rows.
    h0 = jnp.zeros((1, hidden_dim), jnp.float32)
    c0 = jnp.zeros((1, hidden_dim), jnp.float32)

    yt = main_model_forward(params, type_ids, value_ids, h0, c0,
                            parent, context_window)
    yt = jax.block_until_ready(yt)
    assert yt.shape == (1, context_window)
    assert bool(jnp.all(jnp.isfinite(yt)))
    print("KERNEL_OK")
</pallas_src>

<mosaic_0001>
module attributes {stable_mosaic.version = 11 : i64} {
  func.func @_fused_kernel(%arg0: memref<1xi32, #tpu.memory_space<smem>>, %arg1: memref<8x32xf32, #tpu.memory_space<vmem>>, %arg2: memref<1x32xf32, #tpu.memory_space<vmem>>, %arg3: memref<1x32xf32, #tpu.memory_space<vmem>>, %arg4: memref<32x128xf32, #tpu.memory_space<vmem>>, %arg5: memref<32x128xf32, #tpu.memory_space<vmem>>, %arg6: memref<1x128xf32, #tpu.memory_space<vmem>>, %arg7: memref<32x32xf32, #tpu.memory_space<vmem>>, %arg8: memref<32x32xf32, #tpu.memory_space<vmem>>, %arg9: memref<1x32xf32, #tpu.memory_space<vmem>>, %arg10: memref<96x32xf32, #tpu.memory_space<vmem>>, %arg11: memref<32x4xf32, #tpu.memory_space<vmem>>, %arg12: memref<1x4xf32, #tpu.memory_space<vmem>>, %arg13: memref<1x4xf32, #tpu.memory_space<vmem>>, %arg14: memref<4x32xf32, #tpu.memory_space<vmem>>) attributes {dimension_semantics = [], scalar_prefetch = 0 : i64, scratch_operands = 1 : i64, tpu.core_type = #tpu.core_type<tc>} {
    %c0 = arith.constant 0 : index
    %c0_0 = arith.constant 0 : index
    %0 = vector.load %arg1[%c0, %c0_0] : memref<8x32xf32, #tpu.memory_space<vmem>>, vector<8x32xf32>
    %c0_1 = arith.constant 0 : index
    %c0_2 = arith.constant 0 : index
    %1 = vector.load %arg4[%c0_1, %c0_2] : memref<32x128xf32, #tpu.memory_space<vmem>>, vector<32x128xf32>
    %cst = arith.constant dense<0.000000e+00> : vector<8x128xf32>
    %2 = tpu.matmul %0, %1, %cst {dimension_numbers = #tpu.dot_dimension_numbers<[1], [0], [0], [1], [0, 0, 1, 1], [], []>} : vector<8x32xf32>, vector<32x128xf32>, vector<8x128xf32> -> vector<8x128xf32>
    %c0_3 = arith.constant 0 : index
    %c0_4 = arith.constant 0 : index
    %3 = vector.load %arg6[%c0_3, %c0_4] : memref<1x128xf32, #tpu.memory_space<vmem>>, vector<1x128xf32>
    %4 = vector.broadcast %3 : vector<1x128xf32> to vector<8x128xf32>
    %5 = arith.addf %2, %4 : vector<8x128xf32>
    %c0_5 = arith.constant 0 : index
    %c0_6 = arith.constant 0 : index
    %6 = vector.load %arg5[%c0_5, %c0_6] : memref<32x128xf32, #tpu.memory_space<vmem>>, vector<32x128xf32>
    %c0_7 = arith.constant 0 : index
    %c0_8 = arith.constant 0 : index
    %7 = vector.load %arg2[%c0_7, %c0_8] : memref<1x32xf32, #tpu.memory_space<vmem>>, vector<1x32xf32>
    %c0_9 = arith.constant 0 : index
    %c0_10 = arith.constant 0 : index
    %8 = vector.load %arg3[%c0_9, %c0_10] : memref<1x32xf32, #tpu.memory_space<vmem>>, vector<1x32xf32>
    %9 = vector.extract_strided_slice %5 {offsets = [0, 0], sizes = [1, 128], strides = [1, 1]} : vector<8x128xf32> to vector<1x128xf32>
    %cst_11 = arith.constant dense<0.000000e+00> : vector<1x128xf32>
    %10 = tpu.matmul %7, %6, %cst_11 {dimension_numbers = #tpu.dot_dimension_numbers<[1], [0], [0], [1], [0, 0, 1, 1], [], []>} : vector<1x32xf32>, vector<32x128xf32>, vector<1x128xf32> -> vector<1x128xf32>
    %11 = arith.addf %9, %10 : vector<1x128xf32>
    %12 = arith.negf %11 : vector<1x128xf32>
    %13 = math.exp %12 : vector<1x128xf32>
    %cst_12 = arith.constant 1.000000e+00 : f32
    %14 = vector.broadcast %cst_12 : f32 to vector<1x128xf32>
    %15 = arith.addf %14, %13 : vector<1x128xf32>
    %16 = arith.divf %14, %15 : vector<1x128xf32>
    %17 = math.tanh %11 : vector<1x128xf32>
    %18 = vector.extract_strided_slice %16 {offsets = [0, 0], sizes = [1, 32], strides = [1, 1]} : vector<1x128xf32> to vector<1x32xf32>
    %19 = vector.extract_strided_slice %16 {offsets = [0, 32], sizes = [1, 32], strides = [1, 1]} : vector<1x128xf32> to vector<1x32xf32>
    %20 = vector.extract_strided_slice %16 {offsets = [0, 96], sizes = [1, 32], strides = [1, 1]} : vector<1x128xf32> to vector<1x32xf32>
    %21 = vector.extract_strided_slice %17 {offsets = [0, 64], sizes = [1, 32], strides = [1, 1]} : vector<1x128xf32> to vector<1x32xf32>
    %22 = arith.mulf %19, %8 : vector<1x32xf32>
    %23 = arith.mulf %18, %21 : vector<1x32xf32>
    %24 = arith.addf %22, %23 : vector<1x32xf32>
    %25 = math.tanh %24 : vector<1x32xf32>
    %26 = arith.mulf %20, %25 : vector<1x32xf32>
    %27 = vector.extract_strided_slice %5 {offsets = [1, 0], sizes = [1, 128], strides = [1, 1]} : vector<8x128xf32> to vector<1x128xf32>
    %cst_13 = arith.constant dense<0.000000e+00> : vector<1x128xf32>
    %28 = tpu.matmul %26, %6, %cst_13 {dimension_numbers = #tpu.dot_dimension_numbers<[1], [0], [0], [1], [0, 0, 1, 1], [], []>} : vector<1x32xf32>, vector<32x128xf32>, vector<1x128xf32> -> vector<1x128xf32>
    %29 = arith.addf %27, %28 : vector<1x128xf32>
    %30 = arith.negf %29 : vector<1x128xf32>
    %31 = math.exp %30 : vector<1x128xf32>
    %cst_14 = arith.constant 1.000000e+00 : f32
    %32 = vector.broadcast %cst_14 : f32 to vector<1x128xf32>
    %33 = arith.addf %32, %31 : vector<1x128xf32>
    %34 = arith.divf %32, %33 : vector<1x128xf32>
    %35 = math.tanh %29 : vector<1x128xf32>
    %36 = vector.extract_strided_slice %34 {offsets = [0, 0], sizes = [1, 32], strides = [1, 1]} : vector<1x128xf32> to vector<1x32xf32>
    %37 = vector.extract_strided_slice %34 {offsets = [0, 32], sizes = [1, 32], strides = [1, 1]} : vector<1x128xf32> to vector<1x32xf32>
    %38 = vector.extract_strided_slice %34 {offsets = [0, 96], sizes = [1, 32], strides = [1, 1]} : vector<1x128xf32> to vector<1x32xf32>
    %39 = vector.extract_strided_slice %35 {offsets = [0, 64], sizes = [1, 32], strides = [1, 1]} : vector<1x128xf32> to vector<1x32xf32>
    %40 = arith.mulf %37, %24 : vector<1x32xf32>
    %41 = arith.mulf %36, %39 : vector<1x32xf32>
    %42 = arith.addf %40, %41 : vector<1x32xf32>
    %43 = math.tanh %42 : vector<1x32xf32>
    %44 = arith.mulf %38, %43 : vector<1x32xf32>
    %45 = vector.extract_strided_slice %5 {offsets = [2, 0], sizes = [1, 128], strides = [1, 1]} : vector<8x128xf32> to vector<1x128xf32>
    %cst_15 = arith.constant dense<0.000000e+00> : vector<1x128xf32>
    %46 = tpu.matmul %44, %6, %cst_15 {dimension_numbers = #tpu.dot_dimension_numbers<[1], [0], [0], [1], [0, 0, 1, 1], [], []>} : vector<1x32xf32>, vector<32x128xf32>, vector<1x128xf32> -> vector<1x128xf32>
    %47 = arith.addf %45, %46 : vector<1x128xf32>
    %48 = arith.negf %47 : vector<1x128xf32>
    %49 = math.exp %48 : vector<1x128xf32>
    %cst_16 = arith.constant 1.000000e+00 : f32
    %50 = vector.broadcast %cst_16 : f32 to vector<1x128xf32>
    %51 = arith.addf %50, %49 : vector<1x128xf32>
    %52 = arith.divf %50, %51 : vector<1x128xf32>
    %53 = math.tanh %47 : vector<1x128xf32>
    %54 = vector.extract_strided_slice %52 {offsets = [0, 0], sizes = [1, 32], strides = [1, 1]} : vector<1x128xf32> to vector<1x32xf32>
    %55 = vector.extract_strided_slice %52 {offsets = [0, 32], sizes = [1, 32], strides = [1, 1]} : vector<1x128xf32> to vector<1x32xf32>
    %56 = vector.extract_strided_slice %52 {offsets = [0, 96], sizes = [1, 32], strides = [1, 1]} : vector<1x128xf32> to vector<1x32xf32>
    %57 = vector.extract_strided_slice %53 {offsets = [0, 64], sizes = [1, 32], strides = [1, 1]} : vector<1x128xf32> to vector<1x32xf32>
    %58 = arith.mulf %55, %42 : vector<1x32xf32>
    %59 = arith.mulf %54, %57 : vector<1x32xf32>
    %60 = arith.addf %58, %59 : vector<1x32xf32>
    %61 = math.tanh %60 : vector<1x32xf32>
    %62 = arith.mulf %56, %61 : vector<1x32xf32>
    %63 = vector.extract_strided_slice %5 {offsets = [3, 0], sizes = [1, 128], strides = [1, 1]} : vector<8x128xf32> to vector<1x128xf32>
    %cst_17 = arith.constant dense<0.000000e+00> : vector<1x128xf32>
    %64 = tpu.matmul %62, %6, %cst_17 {dimension_numbers = #tpu.dot_dimension_numbers<[1], [0], [0], [1], [0, 0, 1, 1], [], []>} : vector<1x32xf32>, vector<32x128xf32>, vector<1x128xf32> -> vector<1x128xf32>
    %65 = arith.addf %63, %64 : vector<1x128xf32>
    %66 = arith.negf %65 : vector<1x128xf32>
    %67 = math.exp %66 : vector<1x128xf32>
    %cst_18 = arith.constant 1.000000e+00 : f32
    %68 = vector.broadcast %cst_18 : f32 to vector<1x128xf32>
    %69 = arith.addf %68, %67 : vector<1x128xf32>
    %70 = arith.divf %68, %69 : vector<1x128xf32>
    %71 = math.tanh %65 : vector<1x128xf32>
    %72 = vector.extract_strided_slice %70 {offsets = [0, 0], sizes = [1, 32], strides = [1, 1]} : vector<1x128xf32> to vector<1x32xf32>
    %73 = vector.extract_strided_slice %70 {offsets = [0, 32], sizes = [1, 32], strides = [1, 1]} : vector<1x128xf32> to vector<1x32xf32>
    %74 = vector.extract_strided_slice %70 {offsets = [0, 96], sizes = [1, 32], strides = [1, 1]} : vector<1x128xf32> to vector<1x32xf32>
    %75 = vector.extract_strided_slice %71 {offsets = [0, 64], sizes = [1, 32], strides = [1, 1]} : vector<1x128xf32> to vector<1x32xf32>
    %76 = arith.mulf %73, %60 : vector<1x32xf32>
    %77 = arith.mulf %72, %75 : vector<1x32xf32>
    %78 = arith.addf %76, %77 : vector<1x32xf32>
    %79 = math.tanh %78 : vector<1x32xf32>
    %80 = arith.mulf %74, %79 : vector<1x32xf32>
    %81 = vector.extract_strided_slice %5 {offsets = [4, 0], sizes = [1, 128], strides = [1, 1]} : vector<8x128xf32> to vector<1x128xf32>
    %cst_19 = arith.constant dense<0.000000e+00> : vector<1x128xf32>
    %82 = tpu.matmul %80, %6, %cst_19 {dimension_numbers = #tpu.dot_dimension_numbers<[1], [0], [0], [1], [0, 0, 1, 1], [], []>} : vector<1x32xf32>, vector<32x128xf32>, vector<1x128xf32> -> vector<1x128xf32>
    %83 = arith.addf %81, %82 : vector<1x128xf32>
    %84 = arith.negf %83 : vector<1x128xf32>
    %85 = math.exp %84 : vector<1x128xf32>
    %cst_20 = arith.constant 1.000000e+00 : f32
    %86 = vector.broadcast %cst_20 : f32 to vector<1x128xf32>
    %87 = arith.addf %86, %85 : vector<1x128xf32>
    %88 = arith.divf %86, %87 : vector<1x128xf32>
    %89 = math.tanh %83 : vector<1x128xf32>
    %90 = vector.extract_strided_slice %88 {offsets = [0, 0], sizes = [1, 32], strides = [1, 1]} : vector<1x128xf32> to vector<1x32xf32>
    %91 = vector.extract_strided_slice %88 {offsets = [0, 32], sizes = [1, 32], strides = [1, 1]} : vector<1x128xf32> to vector<1x32xf32>
    %92 = vector.extract_strided_slice %88 {offsets = [0, 96], sizes = [1, 32], strides = [1, 1]} : vector<1x128xf32> to vector<1x32xf32>
    %93 = vector.extract_strided_slice %89 {offsets = [0, 64], sizes = [1, 32], strides = [1, 1]} : vector<1x128xf32> to vector<1x32xf32>
    %94 = arith.mulf %91, %78 : vector<1x32xf32>
    %95 = arith.mulf %90, %93 : vector<1x32xf32>
    %96 = arith.addf %94, %95 : vector<1x32xf32>
    %97 = math.tanh %96 : vector<1x32xf32>
    %98 = arith.mulf %92, %97 : vector<1x32xf32>
    %c0_21 = arith.constant 0 : index
    %c0_22 = arith.constant 0 : index
    %99 = vector.load %arg14[%c0_21, %c0_22] : memref<4x32xf32, #tpu.memory_space<vmem>>, vector<1x32xf32>
    tpu.vector_store %arg14[%c0_21, %c0_22], %98 {strides = array<i32>} : memref<4x32xf32, #tpu.memory_space<vmem>>, vector<1x32xf32>,
    %100 = vector.extract_strided_slice %5 {offsets = [5, 0], sizes = [1, 128], strides = [1, 1]} : vector<8x128xf32> to vector<1x128xf32>
    %cst_23 = arith.constant dense<0.000000e+00> : vector<1x128xf32>
    %101 = tpu.matmul %98, %6, %cst_23 {dimension_numbers = #tpu.dot_dimension_numbers<[1], [0], [0], [1], [0, 0, 1, 1], [], []>} : vector<1x32xf32>, vector<32x128xf32>, vector<1x128xf32> -> vector<1x128xf32>
    %102 = arith.addf %100, %101 : vector<1x128xf32>
    %103 = arith.negf %102 : vector<1x128xf32>
    %104 = math.exp %103 : vector<1x128xf32>
    %cst_24 = arith.constant 1.000000e+00 : f32
    %105 = vector.broadcast %cst_24 : f32 to vector<1x128xf32>
    %106 = arith.addf %105, %104 : vector<1x128xf32>
    %107 = arith.divf %105, %106 : vector<1x128xf32>
    %108 = math.tanh %102 : vector<1x128xf32>
    %109 = vector.extract_strided_slice %107 {offsets = [0, 0], sizes = [1, 32], strides = [1, 1]} : vector<1x128xf32> to vector<1x32xf32>
    %110 = vector.extract_strided_slice %107 {offsets = [0, 32], sizes = [1, 32], strides = [1, 1]} : vector<1x128xf32> to vector<1x32xf32>
    %111 = vector.extract_strided_slice %107 {offsets = [0, 96], sizes = [1, 32], strides = [1, 1]} : vector<1x128xf32> to vector<1x32xf32>
    %112 = vector.extract_strided_slice %108 {offsets = [0, 64], sizes = [1, 32], strides = [1, 1]} : vector<1x128xf32> to vector<1x32xf32>
    %113 = arith.mulf %110, %96 : vector<1x32xf32>
    %114 = arith.mulf %109, %112 : vector<1x32xf32>
    %115 = arith.addf %113, %114 : vector<1x32xf32>
    %116 = math.tanh %115 : vector<1x32xf32>
    %117 = arith.mulf %111, %116 : vector<1x32xf32>
    %c1 = arith.constant 1 : index
    %c0_25 = arith.constant 0 : index
    %118 = vector.load %arg14[%c1, %c0_25] : memref<4x32xf32, #tpu.memory_space<vmem>>, vector<1x32xf32>
    tpu.vector_store %arg14[%c1, %c0_25], %117 {strides = array<i32>} : memref<4x32xf32, #tpu.memory_space<vmem>>, vector<1x32xf32>,
    %119 = vector.extract_strided_slice %5 {offsets = [6, 0], sizes = [1, 128], strides = [1, 1]} : vector<8x128xf32> to vector<1x128xf32>
    %cst_26 = arith.constant dense<0.000000e+00> : vector<1x128xf32>
    %120 = tpu.matmul %117, %6, %cst_26 {dimension_numbers = #tpu.dot_dimension_numbers<[1], [0], [0], [1], [0, 0, 1, 1], [], []>} : vector<1x32xf32>, vector<32x128xf32>, vector<1x128xf32> -> vector<1x128xf32>
    %121 = arith.addf %119, %120 : vector<1x128xf32>
    %122 = arith.negf %121 : vector<1x128xf32>
    %123 = math.exp %122 : vector<1x128xf32>
    %cst_27 = arith.constant 1.000000e+00 : f32
    %124 = vector.broadcast %cst_27 : f32 to vector<1x128xf32>
    %125 = arith.addf %124, %123 : vector<1x128xf32>
    %126 = arith.divf %124, %125 : vector<1x128xf32>
    %127 = math.tanh %121 : vector<1x128xf32>
    %128 = vector.extract_strided_slice %126 {offsets = [0, 0], sizes = [1, 32], strides = [1, 1]} : vector<1x128xf32> to vector<1x32xf32>
    %129 = vector.extract_strided_slice %126 {offsets = [0, 32], sizes = [1, 32], strides = [1, 1]} : vector<1x128xf32> to vector<1x32xf32>
    %130 = vector.extract_strided_slice %126 {offsets = [0, 96], sizes = [1, 32], strides = [1, 1]} : vector<1x128xf32> to vector<1x32xf32>
    %131 = vector.extract_strided_slice %127 {offsets = [0, 64], sizes = [1, 32], strides = [1, 1]} : vector<1x128xf32> to vector<1x32xf32>
    %132 = arith.mulf %129, %115 : vector<1x32xf32>
    %133 = arith.mulf %128, %131 : vector<1x32xf32>
    %134 = arith.addf %132, %133 : vector<1x32xf32>
    %135 = math.tanh %134 : vector<1x32xf32>
    %136 = arith.mulf %130, %135 : vector<1x32xf32>
    %c2 = arith.constant 2 : index
    %c0_28 = arith.constant 0 : index
    %137 = vector.load %arg14[%c2, %c0_28] : memref<4x32xf32, #tpu.memory_space<vmem>>, vector<1x32xf32>
    tpu.vector_store %arg14[%c2, %c0_28], %136 {strides = array<i32>} : memref<4x32xf32, #tpu.memory_space<vmem>>, vector<1x32xf32>,
    %138 = vector.extract_strided_slice %5 {offsets = [7, 0], sizes = [1, 128], strides = [1, 1]} : vector<8x128xf32> to vector<1x128xf32>
    %cst_29 = arith.constant dense<0.000000e+00> : vector<1x128xf32>
    %139 = tpu.matmul %136, %6, %cst_29 {dimension_numbers = #tpu.dot_dimension_numbers<[1], [0], [0], [1], [0, 0, 1, 1], [], []>} : vector<1x32xf32>, vector<32x128xf32>, vector<1x128xf32> -> vector<1x128xf32>
    %140 = arith.addf %138, %139 : vector<1x128xf32>
    %141 = arith.negf %140 : vector<1x128xf32>
    %142 = math.exp %141 : vector<1x128xf32>
    %cst_30 = arith.constant 1.000000e+00 : f32
    %143 = vector.broadcast %cst_30 : f32 to vector<1x128xf32>
    %144 = arith.addf %143, %142 : vector<1x128xf32>
    %145 = arith.divf %143, %144 : vector<1x128xf32>
    %146 = math.tanh %140 : vector<1x128xf32>
    %147 = vector.extract_strided_slice %145 {offsets = [0, 0], sizes = [1, 32], strides = [1, 1]} : vector<1x128xf32> to vector<1x32xf32>
    %148 = vector.extract_strided_slice %145 {offsets = [0, 32], sizes = [1, 32], strides = [1, 1]} : vector<1x128xf32> to vector<1x32xf32>
    %149 = vector.extract_strided_slice %145 {offsets = [0, 96], sizes = [1, 32], strides = [1, 1]} : vector<1x128xf32> to vector<1x32xf32>
    %150 = vector.extract_strided_slice %146 {offsets = [0, 64], sizes = [1, 32], strides = [1, 1]} : vector<1x128xf32> to vector<1x32xf32>
    %151 = arith.mulf %148, %134 : vector<1x32xf32>
    %152 = arith.mulf %147, %150 : vector<1x32xf32>
    %153 = arith.addf %151, %152 : vector<1x32xf32>
    %154 = math.tanh %153 : vector<1x32xf32>
    %155 = arith.mulf %149, %154 : vector<1x32xf32>
    %c3 = arith.constant 3 : index
    %c0_31 = arith.constant 0 : index
    %156 = vector.load %arg14[%c3, %c0_31] : memref<4x32xf32, #tpu.memory_space<vmem>>, vector<1x32xf32>
    tpu.vector_store %arg14[%c3, %c0_31], %155 {strides = array<i32>} : memref<4x32xf32, #tpu.memory_space<vmem>>, vector<1x32xf32>,
    %c0_32 = arith.constant 0 : index
    %c0_33 = arith.constant 0 : index
    %157 = vector.load %arg14[%c0_32, %c0_33] : memref<4x32xf32, #tpu.memory_space<vmem>>, vector<4x32xf32>
    %c0_34 = arith.constant 0 : index
    %158 = memref.load %arg0[%c0_34] : memref<1xi32, #tpu.memory_space<smem>>
    %159 = arith.index_cast %158 : i32 to index
    %c0_35 = arith.constant 0 : index
    %160 = vector.load %arg14[%159, %c0_35] : memref<4x32xf32, #tpu.memory_space<vmem>>, vector<1x32xf32>
    %c0_36 = arith.constant 0 : index
    %c0_37 = arith.constant 0 : index
    %161 = vector.load %arg8[%c0_36, %c0_37] : memref<32x32xf32, #tpu.memory_space<vmem>>, vector<32x32xf32>
    %cst_38 = arith.constant dense<0.000000e+00> : vector<1x32xf32>
    %162 = tpu.matmul %155, %161, %cst_38 {dimension_numbers = #tpu.dot_dimension_numbers<[1], [0], [0], [1], [0, 0, 1, 1], [], []>} : vector<1x32xf32>, vector<32x32xf32>, vector<1x32xf32> -> vector<1x32xf32>
    %c0_39 = arith.constant 0 : index
    %c0_40 = arith.constant 0 : index
    %163 = vector.load %arg7[%c0_39, %c0_40] : memref<32x32xf32, #tpu.memory_space<vmem>>, vector<32x32xf32>
    %cst_41 = arith.constant dense<0.000000e+00> : vector<4x32xf32>
    %164 = tpu.matmul %157, %163, %cst_41 {dimension_numbers = #tpu.dot_dimension_numbers<[1], [0], [0], [1], [0, 0, 1, 1], [], []>} : vector<4x32xf32>, vector<32x32xf32>, vector<4x32xf32> -> vector<4x32xf32>
    %165 = vector.broadcast %162 : vector<1x32xf32> to vector<4x32xf32>
    %166 = arith.addf %164, %165 : vector<4x32xf32>
    %167 = math.tanh %166 : vector<4x32xf32>
    %c0_42 = arith.constant 0 : index
    %c0_43 = arith.constant 0 : index
    %168 = vector.load %arg9[%c0_42, %c0_43] : memref<1x32xf32, #tpu.memory_space<vmem>>, vector<1x32xf32>
    %169 = vector.broadcast %168 : vector<1x32xf32> to vector<4x32xf32>
    %170 = arith.mulf %167, %169 : vector<4x32xf32>
    %cst_44 = arith.constant dense<0.000000e+00> : vector<4xf32>
    %171 = vector.multi_reduction <add>, %170, %cst_44 [1] : vector<4x32xf32> to vector<4xf32>
    %172 = vector.shape_cast %171 : vector<4xf32> to vector<4x1xf32>
    %cst_45 = arith.constant dense<0xFF800000> : vector<1xf32>
    %173 = vector.multi_reduction <maximumf>, %172, %cst_45 [0] : vector<4x1xf32> to vector<1xf32>
    %174 = vector.shape_cast %173 : vector<1xf32> to vector<1x1xf32>
    %175 = vector.broadcast %174 : vector<1x1xf32> to vector<4x1xf32>
    %176 = arith.subf %172, %175 : vector<4x1xf32>
    %177 = math.exp %176 : vector<4x1xf32>
    %cst_46 = arith.constant dense<0.000000e+00> : vector<1xf32>
    %178 = vector.multi_reduction <add>, %177, %cst_46 [0] : vector<4x1xf32> to vector<1xf32>
    %179 = vector.shape_cast %178 : vector<1xf32> to vector<1x1xf32>
    %180 = math.log %179 : vector<1x1xf32>
    %181 = vector.broadcast %180 : vector<1x1xf32> to vector<4x1xf32>
    %182 = arith.subf %176, %181 : vector<4x1xf32>
    %183 = vector.broadcast %182 : vector<4x1xf32> to vector<4x32xf32>
    %184 = arith.mulf %183, %157 : vector<4x32xf32>
    %cst_47 = arith.constant dense<0.000000e+00> : vector<32xf32>
    %185 = vector.multi_reduction <add>, %184, %cst_47 [0] : vector<4x32xf32> to vector<32xf32>
    %186 = vector.shape_cast %185 : vector<32xf32> to vector<1x32xf32>
    %187 = tpu.concatenate %155, %186, %160 in 1 : vector<1x32xf32>, vector<1x32xf32>, vector<1x32xf32> -> vector<1x96xf32>
    %c0_48 = arith.constant 0 : index
    %c0_49 = arith.constant 0 : index
    %188 = vector.load %arg10[%c0_48, %c0_49] : memref<96x32xf32, #tpu.memory_space<vmem>>, vector<96x32xf32>
    %cst_50 = arith.constant dense<0.000000e+00> : vector<1x32xf32>
    %189 = tpu.matmul %187, %188, %cst_50 {dimension_numbers = #tpu.dot_dimension_numbers<[1], [0], [0], [1], [0, 0, 1, 1], [], []>} : vector<1x96xf32>, vector<96x32xf32>, vector<1x32xf32> -> vector<1x32xf32>
    %190 = math.tanh %189 : vector<1x32xf32>
    %c0_51 = arith.constant 0 : index
    %c0_52 = arith.constant 0 : index
    %191 = vector.load %arg11[%c0_51, %c0_52] : memref<32x4xf32, #tpu.memory_space<vmem>>, vector<32x4xf32>
    %cst_53 = arith.constant dense<0.000000e+00> : vector<1x4xf32>
    %192 = tpu.matmul %190, %191, %cst_53 {dimension_numbers = #tpu.dot_dimension_numbers<[1], [0], [0], [1], [0, 0, 1, 1], [], []>} : vector<1x32xf32>, vector<32x4xf32>, vector<1x4xf32> -> vector<1x4xf32>
    %c0_54 = arith.constant 0 : index
    %c0_55 = arith.constant 0 : index
    %193 = vector.load %arg12[%c0_54, %c0_55] : memref<1x4xf32, #tpu.memory_space<vmem>>, vector<1x4xf32>
    %194 = arith.addf %192, %193 : vector<1x4xf32>
    %cst_56 = arith.constant dense<0xFF800000> : vector<1xf32>
    %195 = vector.multi_reduction <maximumf>, %194, %cst_56 [1] : vector<1x4xf32> to vector<1xf32>
    %196 = vector.shape_cast %195 : vector<1xf32> to vector<1x1xf32>
    %197 = vector.broadcast %196 : vector<1x1xf32> to vector<1x4xf32>
    %198 = arith.subf %194, %197 : vector<1x4xf32>
    %199 = math.exp %198 : vector<1x4xf32>
    %cst_57 = arith.constant dense<0.000000e+00> : vector<1xf32>
    %200 = vector.multi_reduction <add>, %199, %cst_57 [1] : vector<1x4xf32> to vector<1xf32>
    %201 = vector.shape_cast %200 : vector<1xf32> to vector<1x1xf32>
    %202 = math.log %201 : vector<1x1xf32>
    %203 = vector.broadcast %202 : vector<1x1xf32> to vector<1x4xf32>
    %204 = arith.subf %198, %203 : vector<1x4xf32>
    %c0_58 = arith.constant 0 : index
    %c0_59 = arith.constant 0 : index
    %205 = vector.load %arg13[%c0_58, %c0_59] : memref<1x4xf32, #tpu.memory_space<vmem>>, vector<1x4xf32>
    tpu.vector_store %arg13[%c0_58, %c0_59], %204 {strides = array<i32>} : memref<1x4xf32, #tpu.memory_space<vmem>>, vector<1x4xf32>,
    return
  }
}

</mosaic_0001>

<bundles_post_ra>
// kernel: main_model_forward.1
= control target key start
LH: loop header
LB: loop body
LE: loop exit
PB: predicated region body
PF: predicated region fallthrough
CT: control target
= control target key end

     0   :  { %s1271_s0 = inlined_call_operand.<no memory space> [shape: s32[1], index: 0, kind: input, shape index: {}]   ;;  %s1272_s1 = inlined_call_operand.vmem [shape: f32[8,32], index: 1, kind: input, shape index: {}]   ;;  %s1273_s2 = inlined_call_operand.vmem [shape: f32[1,32], index: 2, kind: input, shape index: {}]   ;;  %s1274_s3 = inlined_call_operand.vmem [shape: f32[1,32], index: 3, kind: input, shape index: {}]   ;;  %s1275_s4 = inlined_call_operand.vmem [shape: f32[32,128], index: 4, kind: input, shape index: {}]   ;;  %s1276_s5 = inlined_call_operand.vmem [shape: f32[32,128], index: 5, kind: input, shape index: {}]   ;;  %s1277_s6 = inlined_call_operand.vmem [shape: f32[1,128], index: 6, kind: input, shape index: {}]   ;;  %s1278_s7 = inlined_call_operand.vmem [shape: f32[32,32], index: 7, kind: input, shape index: {}]   ;;  %s1279_s8 = inlined_call_operand.vmem [shape: f32[32,32], index: 8, kind: input, shape index: {}]   ;;  %s1280_s9 = inlined_call_operand.vmem [shape: f32[1,32], index: 9, kind: input, shape index: {}]   ;;  %s1281_s10 = inlined_call_operand.vmem [shape: f32[96,32], index: 10, kind: input, shape index: {}]   ;;  %s1282_s11 = inlined_call_operand.vmem [shape: f32[32,4], index: 11, kind: input, shape index: {}]   ;;  %s1283_s12 = inlined_call_operand.vmem [shape: f32[1,4], index: 12, kind: input, shape index: {}]   ;;  %s1284_s13 = inlined_call_operand.hbm [shape: f32[1,4], index: 13, kind: output, shape index: {}]  }
   0x1   :  { %v50_v0 = vld [vmem:[%s1275_s4 + $0x18] sm:$0xff]  ;;  %v49_v1 = vld [vmem:[%s1275_s4 + $0x10] sm:$0xff]  ;;  %v48_v4 = vld [vmem:[%s1275_s4 + $0x8] sm:$0xff] }
   0x2   :  { %v82_v2 = vld [vmem:[%s1276_s5 + $0x18] sm:$0xff]  ;;  %71 = vmatpush.msra.mxu0 %v50_v0  ;;  %v81_v3 = vld [vmem:[%s1276_s5 + $0x10] sm:$0xff]  ;;  %v80_v5 = vld [vmem:[%s1276_s5 + $0x8] sm:$0xff] }
   0x3   :  { %100 = vmatpush.msra.mxu1 %v82_v2  ;;  %168 = vmatpush.msra.mxu2 %v82_v2  ;;  %v47_v6 = vld [vmem:[%s1275_s4] sm:$0xff] }
   0x4   :  { %528 = vmatpush.msra.mxu3 %v82_v2  ;;  %72 = vmatpush.msra.mxu0 %v49_v1  ;;  %v79_v7 = vld [vmem:[%s1276_s5] sm:$0xff] }
   0x5   :  { %101 = vmatpush.msra.mxu1 %v81_v3  ;;  %169 = vmatpush.msra.mxu2 %v81_v3 }
   0x6   :  { %529 = vmatpush.msra.mxu3 %v81_v3 }
   0x7   :  { %19 = vsyncpa [#allocation5], 0  ;;  %73 = vmatpush.msra.mxu0 %v48_v4  ;;  %102 = vmatpush.msra.mxu1 %v80_v5  ;;  %v46_v8 = vld [vmem:[%s1272_s1] sm:$0xff]  ;;  %vm55_vm0 = vcmask 261120   ;;  %s999_s4 = smov 64   ;;  %s1000_s29 = smov 32  }
   0x8   :  { %v83_v9 = vld [vmem:[%s1273_s2] sm:$0x1]  ;;  %170 = vmatpush.msra.mxu2 %v80_v5  ;;  %530 = vmatpush.msra.mxu3 %v80_v5  ;;  %s663_s1 = scalar_lea.vmem [#allocation2], %s1271_s0  ;;  %s860_s14 = sshll.u32 %s1284_s13, 4  ;;  %s861_s14 = int_to_ptr.hbm [resolvable:$true] %s860_s14 }
   0x9   :  { %74 = vmatpush.msra.mxu0 %v47_v6  ;;  %103 = vmatpush.msra.mxu1 %v79_v7  ;;  %v894_v10 = vld [vmem:[%s1277_s6] ss:$0 sm:$0xff] }
   0xa   :  { %870 = vmatmul.msk.f32.vlgmr.msra.gmra.mxu0 %vm55_vm0, %v46_v8  ;;  %871 = vmatmul.msk.f32.vlgmr.msra.gmra.mxu1 %vm55_vm0, %v83_v9  ;;  %v895_v16 = vld [vmem:[%s1274_s3] ss:$0 sm:$0xff] }
   0xb   :  { %171 = vmatpush.msra.mxu2 %v79_v7  ;;  %238 = vmatpush.msrb.mxu1 %v82_v2 }
   0xc   :  { %308 = vmatpush.msrb.mxu0 %v82_v2  ;;  %531 = vmatpush.msra.mxu3 %v79_v7 }
   0xd   :  { %453 = vmatpush.msrb.mxu2 %v82_v2  ;;  %239 = vmatpush.msrb.mxu1 %v81_v3 }
   0xe   :  { %309 = vmatpush.msrb.mxu0 %v81_v3 }
   0xf   :  { %454 = vmatpush.msrb.mxu2 %v81_v3  ;;  %240 = vmatpush.msrb.mxu1 %v80_v5 }
  0x10   :  { %310 = vmatpush.msrb.mxu0 %v80_v5 }
  0x11   :  { %455 = vmatpush.msrb.mxu2 %v80_v5  ;;  %241 = vmatpush.msrb.mxu1 %v79_v7 }
  0x12   :  { %311 = vmatpush.msrb.mxu0 %v79_v7 }
  0x13   :  { %378 = vmatpush.msra.mxu1 %v82_v2  ;;  %456 = vmatpush.msrb.mxu2 %v79_v7 }
  0x14   :  { %603 = vmatpush.msra.mxu0 %v82_v2 }
  0x15   :  { %379 = vmatpush.msra.mxu1 %v81_v3 }
  0x16   :  { %604 = vmatpush.msra.mxu0 %v81_v3 }
  0x17   :  { %380 = vmatpush.msra.mxu1 %v80_v5 }
  0x18   :  { %605 = vmatpush.msra.mxu0 %v80_v5 }
  0x19   :  { %381 = vmatpush.msra.mxu1 %v79_v7 }
  0x1a   :  { %606 = vmatpush.msra.mxu0 %v79_v7 }
  0x87   :  { %v76_v11 = vpop.f32.mrf.mxu0  ;;  %v105_v12 = vpop.f32.mrf.mxu1 }
  0x88   :  { %v1107_v13 = vadd.f32 %v894_v10, %v76_v11 }
  0x8a   :  { %v108_v14 = vadd.f32 %v105_v12, %v1107_v13 }
  0x8c   :  { %897 = vtanh.f32 %v108_v14  ;;  %v872_v17 = vmul.f32 -1.442695, %v108_v14 }
  0x8e   :  { %899 = vpow2.f32 %v872_v17 }
  0x92   :  { %v898_v15 = vpop.eup %897 }
  0x93   :  { %136 = vrot.lane.b32.xlu0 %v898_v15, %s999_s4 }
  0x94   :  { %v900_v18 = vpop.eup %899 }
  0x95   :  { %v112_v19 = vadd.f32 1.0, %v900_v18 }
  0x97   :  { %901 = vrcp.f32 %v112_v19  ;;  %v124_v25 = vand.u32 2147483648, %v112_v19  ;;  %vm118_vm2 = vweird.f32 %v112_v19  ;;  %v122_v26 = vand.u32 2147483647, %v112_v19 }
  0x99   :  { %v125_v28 = vor.u32 1.1754944e-38, %v124_v25  ;;  %vm123_vm4 = vcmp.eq.f32.partialorder %v122_v26, 8.507059e+37 }
  0x9b   :  { %131 = vrot.lane.b32.xlu0 %v895_v16, %s1000_s29 }
  0x9d   :  { %v902_v20 = vpop.eup %901 }
  0x9e   :  { %v114_v21 = vmul.f32 %v902_v20, %v112_v19  ;;  %vm119_vm1 = vweird.f32 %v902_v20 }
  0x9f   :  { %vm120_vm3 = vmor %vm118_vm2, %vm119_vm1 }
  0xa0   :  { %v115_v22 = vsub.f32 1.0, %v114_v21 }
  0xa2   :  { %v116_v23 = vmul.f32 %v902_v20, %v115_v22 }
  0xa4   :  { %v117_v24 = vadd.f32 %v902_v20, %v116_v23 }
  0xa6   :  { %v121_v27 = vsel %vm120_vm3, %v902_v20, %v117_v24 }
  0xa7   :  { %v126_v30 = vsel %vm123_vm4, %v125_v28, %v121_v27 }
 0x105   :  { %v137_v29 = vpop.permute.xlu0 %136 }
 0x106   :  { %v139_v31 = vmul.f32 %v137_v29, %v126_v30 }
 0x108   :  { %141 = vrot.lane.b32.xlu1 %v139_v31, %s1000_s29 }
 0x10d   :  { %v132_v32 = vpop.permute.xlu0 %131 }
 0x10e   :  { %v134_v33 = vmul.f32 %v132_v32, %v126_v30 }
 0x17a   :  { %v142_v34 = vpop.permute.xlu1 %141 }
 0x17b   :  { %v144_v35 = vadd.f32 %v142_v34, %v134_v33 }
 0x17d   :  { %903 = vtanh.f32 %v144_v35  ;;  %v201_v59 = vrot.slane %v144_v35, 7 }
 0x183   :  { %v904_v36 = vpop.eup %903 }
 0x184   :  { %147 = vrot.lane.b32.xlu1 %v904_v36, %s999_s4 }
 0x1f6   :  { %v148_v37 = vpop.permute.xlu1 %147 }
 0x1f7   :  { %v150_v38 = vmul.f32 %v148_v37, %v126_v30 }
 0x1f9   :  { %152 = vrot.lane.b32.xlu2 %v150_v38, %s1000_s29 }
 0x253   :  { %v153_v39 = vpop.permute.xlu2 %152 }
 0x254   :  { %873 = vmatmul.msk.f32.vlgmr.msra.gmra.mxu2 %vm55_vm0, %v153_v39 }
 0x2d7   :  { %v173_v40 = vpop.f32.mrf.mxu2 }
 0x2d8   :  { %v177_v41 = vrot.slane %v173_v40, 7 }
 0x2da   :  { %v179_v42 = vadd.f32 %v177_v41, %v1107_v13 }
 0x2dc   :  { %905 = vtanh.f32 %v179_v42  ;;  %v874_v44 = vmul.f32 -1.442695, %v179_v42 }
 0x2de   :  { %907 = vpow2.f32 %v874_v44 }
 0x2e2   :  { %v906_v43 = vpop.eup %905 }
 0x2e3   :  { %205 = vrot.lane.b32.xlu2 %v906_v43, %s999_s4 }
 0x2e4   :  { %v908_v45 = vpop.eup %907 }
 0x2e5   :  { %v183_v46 = vadd.f32 1.0, %v908_v45 }
 0x2e7   :  { %909 = vrcp.f32 %v183_v46  ;;  %v195_v52 = vand.u32 2147483648, %v183_v46  ;;  %vm189_vm6 = vweird.f32 %v183_v46  ;;  %v193_v53 = vand.u32 2147483647, %v183_v46 }
 0x2e9   :  { %v196_v55 = vor.u32 1.1754944e-38, %v195_v52  ;;  %vm194_vm8 = vcmp.eq.f32.partialorder %v193_v53, 8.507059e+37 }
 0x2ed   :  { %v910_v47 = vpop.eup %909 }
 0x2ee   :  { %v185_v48 = vmul.f32 %v910_v47, %v183_v46  ;;  %vm190_vm5 = vweird.f32 %v910_v47 }
 0x2ef   :  { %vm191_vm7 = vmor %vm189_vm6, %vm190_vm5 }
 0x2f0   :  { %v186_v49 = vsub.f32 1.0, %v185_v48 }
 0x2f2   :  { %v187_v50 = vmul.f32 %v910_v47, %v186_v49 }
 0x2f4   :  { %v188_v51 = vadd.f32 %v910_v47, %v187_v50 }
 0x2f6   :  { %v192_v54 = vsel %vm191_vm7, %v910_v47, %v188_v51 }
 0x2f7   :  { %v197_v57 = vsel %vm194_vm8, %v196_v55, %v192_v54 }
 0x2f8   :  { %v203_v60 = vmul.f32 %v201_v59, %v197_v57 }
 0x33d   :  { %v206_v56 = vpop.permute.xlu2 %205 }
 0x33e   :  { %v208_v58 = vmul.f32 %v206_v56, %v197_v57 }
 0x340   :  { %210 = vrot.lane.b32.xlu0 %v208_v58, %s1000_s29 }
 0x3b2   :  { %v211_v61 = vpop.permute.xlu0 %210 }
 0x3b3   :  { %v213_v62 = vadd.f32 %v211_v61, %v203_v60 }
 0x3b5   :  { %911 = vtanh.f32 %v213_v62  ;;  %v271_v24 = vrot.slane %v213_v62, 7 }
 0x3bb   :  { %v912_v63 = vpop.eup %911 }
 0x3bc   :  { %216 = vrot.lane.b32.xlu1 %v912_v63, %s999_s4 }
 0x42e   :  { %v217_v0 = vpop.permute.xlu1 %216 }
 0x42f   :  { %v219_v1 = vmul.f32 %v217_v0, %v197_v57 }
 0x431   :  { %v221_v2 = vrot.slane %v219_v1, 1 }
 0x433   :  { %222 = vrot.lane.b32.xlu2 %v221_v2, %s1000_s29 }
 0x48d   :  { %v223_v3 = vpop.permute.xlu2 %222 }
 0x48e   :  { %875 = vmatmul.msk.f32.vlgmr.msrb.gmra.mxu1 %vm55_vm0, %v223_v3 }
 0x50b   :  { %v243_v4 = vpop.f32.mrf.mxu1 }
 0x50c   :  { %v247_v5 = vrot.slane %v243_v4, 6 }
 0x50e   :  { %v249_v6 = vadd.f32 %v247_v5, %v1107_v13 }
 0x510   :  { %913 = vtanh.f32 %v249_v6  ;;  %v876_v8 = vmul.f32 -1.442695, %v249_v6 }
 0x512   :  { %915 = vpow2.f32 %v876_v8 }
 0x516   :  { %v914_v7 = vpop.eup %913 }
 0x517   :  { %275 = vrot.lane.b32.xlu0 %v914_v7, %s999_s4 }
 0x518   :  { %v916_v9 = vpop.eup %915 }
 0x519   :  { %v253_v10 = vadd.f32 1.0, %v916_v9 }
 0x51b   :  { %917 = vrcp.f32 %v253_v10  ;;  %v265_v17 = vand.u32 2147483648, %v253_v10  ;;  %vm259_vm10 = vweird.f32 %v253_v10  ;;  %v263_v18 = vand.u32 2147483647, %v253_v10 }
 0x51d   :  { %v266_v20 = vor.u32 1.1754944e-38, %v265_v17  ;;  %vm264_vm12 = vcmp.eq.f32.partialorder %v263_v18, 8.507059e+37 }
 0x521   :  { %v918_v11 = vpop.eup %917 }
 0x522   :  { %v255_v12 = vmul.f32 %v918_v11, %v253_v10  ;;  %vm260_vm9 = vweird.f32 %v918_v11 }
 0x523   :  { %vm261_vm11 = vmor %vm259_vm10, %vm260_vm9 }
 0x524   :  { %v256_v14 = vsub.f32 1.0, %v255_v12 }
 0x526   :  { %v257_v15 = vmul.f32 %v918_v11, %v256_v14 }
 0x528   :  { %v258_v16 = vadd.f32 %v918_v11, %v257_v15 }
 0x52a   :  { %v262_v19 = vsel %vm261_vm11, %v918_v11, %v258_v16 }
 0x52b   :  { %v267_v22 = vsel %vm264_vm12, %v266_v20, %v262_v19 }
 0x52c   :  { %v273_v25 = vmul.f32 %v271_v24, %v267_v22 }
 0x589   :  { %v276_v21 = vpop.permute.xlu0 %275 }
 0x58a   :  { %v278_v23 = vmul.f32 %v276_v21, %v267_v22 }
 0x58c   :  { %280 = vrot.lane.b32.xlu1 %v278_v23, %s1000_s29 }
 0x5fe   :  { %v281_v26 = vpop.permute.xlu1 %280 }
 0x5ff   :  { %v283_v27 = vadd.f32 %v281_v26, %v273_v25 }
 0x601   :  { %919 = vtanh.f32 %v283_v27  ;;  %v341_v52 = vrot.slane %v283_v27, 7 }
 0x607   :  { %v920_v28 = vpop.eup %919 }
 0x608   :  { %286 = vrot.lane.b32.xlu2 %v920_v28, %s999_s4 }
 0x662   :  { %v287_v29 = vpop.permute.xlu2 %286 }
 0x663   :  { %v289_v30 = vmul.f32 %v287_v29, %v267_v22 }
 0x665   :  { %v291_v31 = vrot.slane %v289_v30, 2 }
 0x667   :  { %292 = vrot.lane.b32.xlu0 %v291_v31, %s1000_s29 }
 0x6d9   :  { %v293_v32 = vpop.permute.xlu0 %292 }
 0x6da   :  { %877 = vmatmul.msk.f32.vlgmr.msrb.gmra.mxu0 %vm55_vm0, %v293_v32 }
 0x757   :  { %v313_v33 = vpop.f32.mrf.mxu0 }
 0x758   :  { %v317_v34 = vrot.slane %v313_v33, 5 }
 0x75a   :  { %v319_v35 = vadd.f32 %v317_v34, %v1107_v13 }
 0x75c   :  { %921 = vtanh.f32 %v319_v35  ;;  %v878_v37 = vmul.f32 -1.442695, %v319_v35 }
 0x75e   :  { %923 = vpow2.f32 %v878_v37 }
 0x762   :  { %v922_v36 = vpop.eup %921 }
 0x763   :  { %345 = vrot.lane.b32.xlu1 %v922_v36, %s999_s4 }
 0x764   :  { %v924_v38 = vpop.eup %923 }
 0x765   :  { %v323_v39 = vadd.f32 1.0, %v924_v38 }
 0x767   :  { %925 = vrcp.f32 %v323_v39  ;;  %v335_v45 = vand.u32 2147483648, %v323_v39  ;;  %vm329_vm14 = vweird.f32 %v323_v39  ;;  %v333_v46 = vand.u32 2147483647, %v323_v39 }
 0x769   :  { %v336_v48 = vor.u32 1.1754944e-38, %v335_v45  ;;  %vm334_vm1 = vcmp.eq.f32.partialorder %v333_v46, 8.507059e+37 }
 0x76d   :  { %v926_v40 = vpop.eup %925 }
 0x76e   :  { %v325_v41 = vmul.f32 %v926_v40, %v323_v39  ;;  %vm330_vm13 = vweird.f32 %v926_v40 }
 0x76f   :  { %vm331_vm15 = vmor %vm329_vm14, %vm330_vm13 }
 0x770   :  { %v326_v42 = vsub.f32 1.0, %v325_v41 }
 0x772   :  { %v327_v43 = vmul.f32 %v926_v40, %v326_v42 }
 0x774   :  { %v328_v44 = vadd.f32 %v926_v40, %v327_v43 }
 0x776   :  { %v332_v47 = vsel %vm331_vm15, %v926_v40, %v328_v44 }
 0x777   :  { %v337_v50 = vsel %vm334_vm1, %v336_v48, %v332_v47 }
 0x778   :  { %v343_v53 = vmul.f32 %v341_v52, %v337_v50 }
 0x7d5   :  { %v346_v49 = vpop.permute.xlu1 %345 }
 0x7d6   :  { %v348_v51 = vmul.f32 %v346_v49, %v337_v50 }
 0x7d8   :  { %350 = vrot.lane.b32.xlu2 %v348_v51, %s1000_s29 }
 0x832   :  { %v351_v54 = vpop.permute.xlu2 %350 }
 0x833   :  { %v353_v55 = vadd.f32 %v351_v54, %v343_v53 }
 0x835   :  { %927 = vtanh.f32 %v353_v55  ;;  %v411_v17 = vrot.slane %v353_v55, 7 }
 0x83b   :  { %v928_v56 = vpop.eup %927 }
 0x83c   :  { %356 = vrot.lane.b32.xlu0 %v928_v56, %s999_s4 }
 0x8ae   :  { %v357_v57 = vpop.permute.xlu0 %356 }
 0x8af   :  { %v359_v58 = vmul.f32 %v357_v57, %v337_v50 }
 0x8b1   :  { %v361_v59 = vrot.slane %v359_v58, 3 }
 0x8b3   :  { %362 = vrot.lane.b32.xlu1 %v361_v59, %s1000_s29 }
 0x925   :  { %v363_v60 = vpop.permute.xlu1 %362 }
 0x926   :  { %879 = vmatmul.msk.f32.vlgmr.msra.gmra.mxu1 %vm55_vm0, %v363_v60 }
 0x9a3   :  { %v383_v61 = vpop.f32.mrf.mxu1 }
 0x9a4   :  { %v387_v62 = vrot.slane %v383_v61, 4 }
 0x9a6   :  { %v389_v63 = vadd.f32 %v387_v62, %v1107_v13 }
 0x9a8   :  { %929 = vtanh.f32 %v389_v63  ;;  %v880_v1 = vmul.f32 -1.442695, %v389_v63 }
 0x9aa   :  { %931 = vpow2.f32 %v880_v1 }
 0x9ae   :  { %v930_v0 = vpop.eup %929 }
 0x9af   :  { %415 = vrot.lane.b32.xlu2 %v930_v0, %s999_s4 }
 0x9b0   :  { %v932_v2 = vpop.eup %931 }
 0x9b1   :  { %v393_v3 = vadd.f32 1.0, %v932_v2 }
 0x9b3   :  { %933 = vrcp.f32 %v393_v3  ;;  %v405_v9 = vand.u32 2147483648, %v393_v3  ;;  %vm399_vm3 = vweird.f32 %v393_v3  ;;  %v403_v10 = vand.u32 2147483647, %v393_v3 }
 0x9b5   :  { %v406_v12 = vor.u32 1.1754944e-38, %v405_v9  ;;  %vm404_vm5 = vcmp.eq.f32.partialorder %v403_v10, 8.507059e+37 }
 0x9b9   :  { %v934_v4 = vpop.eup %933 }
 0x9ba   :  { %v395_v5 = vmul.f32 %v934_v4, %v393_v3  ;;  %vm400_vm2 = vweird.f32 %v934_v4 }
 0x9bb   :  { %vm401_vm4 = vmor %vm399_vm3, %vm400_vm2  ;;  %vm434_vm3 = vcmask 258052  }
 0x9bc   :  { %v396_v6 = vsub.f32 1.0, %v395_v5 }
 0x9be   :  { %v397_v7 = vmul.f32 %v934_v4, %v396_v6 }
 0x9c0   :  { %v398_v8 = vadd.f32 %v934_v4, %v397_v7 }
 0x9c2   :  { %v402_v11 = vsel %vm401_vm4, %v934_v4, %v398_v8  ;;  %vm509_vm4 = vcmask 259077  }
 0x9c3   :  { %v407_v15 = vsel %vm404_vm5, %v406_v12, %v402_v11  ;;  %vm584_vm5 = vcmask 260102  }
 0x9c4   :  { %v413_v18 = vmul.f32 %v411_v17, %v407_v15 }
 0xa09   :  { %v416_v14 = vpop.permute.xlu2 %415 }
 0xa0a   :  { %v418_v16 = vmul.f32 %v416_v14, %v407_v15 }
 0xa0c   :  { %420 = vrot.lane.b32.xlu0 %v418_v16, %s1000_s29 }
 0xa7e   :  { %v421_v19 = vpop.permute.xlu0 %420 }
 0xa7f   :  { %v423_v20 = vadd.f32 %v421_v19, %v413_v18 }
 0xa81   :  { %935 = vtanh.f32 %v423_v20  ;;  %v486_v45 = vrot.slane %v423_v20, 7 }
 0xa87   :  { %v936_v21 = vpop.eup %935 }
 0xa88   :  { %426 = vrot.lane.b32.xlu1 %v936_v21, %s999_s4 }
 0xafa   :  { %v427_v22 = vpop.permute.xlu1 %426 }
 0xafb   :  { %v1141_v23 = vmul.f32 %v427_v22, %v407_v15 }
 0xafd   :  { %v436_v24 = vrot.slane %v1141_v23, 4 }
 0xaff   :  { %437 = vrot.lane.b32.xlu2 %v436_v24, %s1000_s29 }
 0xb59   :  { %v438_v25 = vpop.permute.xlu2 %437 }
 0xb5a   :  { %881 = vmatmul.msk.f32.vlgmr.msrb.gmra.mxu2 %vm55_vm0, %v438_v25 }
 0xbdd   :  { %v458_v26 = vpop.f32.mrf.mxu2 }
 0xbde   :  { %v462_v27 = vrot.slane %v458_v26, 3 }
 0xbe0   :  { %v464_v28 = vadd.f32 %v462_v27, %v1107_v13 }
 0xbe2   :  { %937 = vtanh.f32 %v464_v28  ;;  %v882_v30 = vmul.f32 -1.442695, %v464_v28 }
 0xbe4   :  { %939 = vpow2.f32 %v882_v30 }
 0xbe8   :  { %v938_v29 = vpop.eup %937 }
 0xbe9   :  { %490 = vrot.lane.b32.xlu0 %v938_v29, %s999_s4 }
 0xbea   :  { %v940_v31 = vpop.eup %939 }
 0xbeb   :  { %v468_v32 = vadd.f32 1.0, %v940_v31 }
 0xbed   :  { %941 = vrcp.f32 %v468_v32  ;;  %v480_v38 = vand.u32 2147483648, %v468_v32  ;;  %vm474_vm7 = vweird.f32 %v468_v32  ;;  %v478_v39 = vand.u32 2147483647, %v468_v32 }
 0xbef   :  { %v481_v41 = vor.u32 1.1754944e-38, %v480_v38  ;;  %vm479_vm9 = vcmp.eq.f32.partialorder %v478_v39, 8.507059e+37 }
 0xbf3   :  { %v942_v33 = vpop.eup %941 }
 0xbf4   :  { %v470_v34 = vmul.f32 %v942_v33, %v468_v32  ;;  %vm475_vm6 = vweird.f32 %v942_v33 }
 0xbf5   :  { %vm476_vm8 = vmor %vm474_vm7, %vm475_vm6  ;;  %vm659_vm6 = vcmask 261127   ;;  %vm728_vm7 = vcmask 257024  }
 0xbf6   :  { %v471_v35 = vsub.f32 1.0, %v470_v34 }
 0xbf8   :  { %v472_v36 = vmul.f32 %v942_v33, %v471_v35 }
 0xbfa   :  { %v473_v37 = vadd.f32 %v942_v33, %v472_v36 }
 0xbfc   :  { %v477_v40 = vsel %vm476_vm8, %v942_v33, %v473_v37  ;;  %vm732_vm8 = vcmask 1043456  }
 0xbfd   :  { %v482_v43 = vsel %vm479_vm9, %v481_v41, %v477_v40  ;;  %vm771_vm9 = vcmask 523264  }
 0xbfe   :  { %v488_v46 = vmul.f32 %v486_v45, %v482_v43 }
 0xc5b   :  { %v491_v42 = vpop.permute.xlu0 %490 }
 0xc5c   :  { %v493_v44 = vmul.f32 %v491_v42, %v482_v43 }
 0xc5e   :  { %495 = vrot.lane.b32.xlu1 %v493_v44, %s1000_s29 }
 0xcd0   :  { %v496_v47 = vpop.permute.xlu1 %495 }
 0xcd1   :  { %v498_v48 = vadd.f32 %v496_v47, %v488_v46 }
 0xcd3   :  { %943 = vtanh.f32 %v498_v48  ;;  %v561_v9 = vrot.slane %v498_v48, 7  ;;  %v697_v48 = vld [vmem:[%s1278_s7 + $0x18] sm:$0xff] }
 0xcd4   :  { %714 = vmatpush.msra.mxu2 %v697_v48 }
 0xcd9   :  { %v944_v49 = vpop.eup %943 }
 0xcda   :  { %501 = vrot.lane.b32.xlu2 %v944_v49, %s999_s4  ;;  %v696_v49 = vld [vmem:[%s1278_s7 + $0x10] sm:$0xff] }
 0xcdb   :  { %715 = vmatpush.msra.mxu2 %v696_v49 }
 0xd34   :  { %v502_v50 = vpop.permute.xlu2 %501 }
 0xd35   :  { %v1150_v51 = vmul.f32 %v502_v50, %v482_v43  ;;  %v695_v50 = vld [vmem:[%s1278_s7 + $0x8] sm:$0xff] }
 0xd36   :  { %716 = vmatpush.msra.mxu2 %v695_v50 }
 0xd37   :  { %v511_v52 = vrot.slane %v1150_v51, 5 }
 0xd39   :  { %512 = vrot.lane.b32.xlu0 %v511_v52, %s1000_s29  ;;  %v668_v52 = vld [vmem:[%s1279_s8 + $0x18] sm:$0xff] }
 0xd3a   :  { %686 = vmatpush.msrb.mxu1 %v668_v52  ;;  %v813_v52 = vld [vmem:[%s1282_s11 + $0x10] sm:$0xff] }
 0xdab   :  { %v513_v53 = vpop.permute.xlu0 %512 }
 0xdac   :  { %883 = vmatmul.msk.f32.vlgmr.msra.gmra.mxu3 %vm55_vm0, %v513_v53  ;;  %v667_v53 = vld [vmem:[%s1279_s8 + $0x10] sm:$0xff] }
 0xdad   :  { %687 = vmatpush.msrb.mxu1 %v667_v53  ;;  %v812_v53 = vld [vmem:[%s1282_s11 + $0x8] sm:$0xff] }
 0xe2f   :  { %v533_v54 = vpop.f32.mrf.mxu3 }
 0xe30   :  { %v537_v55 = vrot.slane %v533_v54, 2  ;;  %v666_v54 = vld [vmem:[%s1279_s8 + $0x8] sm:$0xff] }
 0xe31   :  { %688 = vmatpush.msrb.mxu1 %v666_v54  ;;  %v811_v54 = vld [vmem:[%s1282_s11] sm:$0xff] }
 0xe32   :  { %v539_v56 = vadd.f32 %v537_v55, %v1107_v13  ;;  %v665_v55 = vld [vmem:[%s1279_s8] sm:$0xff] }
 0xe33   :  { %689 = vmatpush.msrb.mxu1 %v665_v55 }
 0xe34   :  { %945 = vtanh.f32 %v539_v56  ;;  %v884_v58 = vmul.f32 -1.442695, %v539_v56 }
 0xe36   :  { %947 = vpow2.f32 %v884_v58 }
 0xe3a   :  { %v946_v57 = vpop.eup %945 }
 0xe3b   :  { %565 = vrot.lane.b32.xlu1 %v946_v57, %s999_s4 }
 0xe3c   :  { %v948_v59 = vpop.eup %947 }
 0xe3d   :  { %v543_v60 = vadd.f32 1.0, %v948_v59 }
 0xe3f   :  { %949 = vrcp.f32 %v543_v60  ;;  %v555_v2 = vand.u32 2147483648, %v543_v60  ;;  %vm549_vm11 = vweird.f32 %v543_v60  ;;  %v553_v3 = vand.u32 2147483647, %v543_v60 }
 0xe41   :  { %v556_v5 = vor.u32 1.1754944e-38, %v555_v2  ;;  %vm554_vm13 = vcmp.eq.f32.partialorder %v553_v3, 8.507059e+37 }
 0xe45   :  { %v950_v61 = vpop.eup %949 }
 0xe46   :  { %v545_v62 = vmul.f32 %v950_v61, %v543_v60  ;;  %vm550_vm10 = vweird.f32 %v950_v61 }
 0xe47   :  { %vm551_vm12 = vmor %vm549_vm11, %vm550_vm10  ;;  %vm787_vm10 = vcmask 785408   ;;  %vm839_vm11 = vcmask 24576  }
 0xe48   :  { %v546_v63 = vsub.f32 1.0, %v545_v62 }
 0xe4a   :  { %v547_v0 = vmul.f32 %v950_v61, %v546_v63 }
 0xe4c   :  { %v548_v1 = vadd.f32 %v950_v61, %v547_v0 }
 0xe4e   :  { %v552_v4 = vsel %vm551_vm12, %v950_v61, %v548_v1  ;;  %v896_v1 = vld [vmem:[%s1280_s9] ss:$0 sm:$0xff] }
 0xe4f   :  { %v557_v7 = vsel %vm554_vm13, %v556_v5, %v552_v4 }
 0xe50   :  { %v563_v10 = vmul.f32 %v561_v9, %v557_v7 }
 0xead   :  { %v566_v6 = vpop.permute.xlu1 %565 }
 0xeae   :  { %v568_v8 = vmul.f32 %v566_v6, %v557_v7 }
 0xeb0   :  { %570 = vrot.lane.b32.xlu2 %v568_v8, %s1000_s29 }
 0xf0a   :  { %v571_v11 = vpop.permute.xlu2 %570 }
 0xf0b   :  { %v573_v12 = vadd.f32 %v571_v11, %v563_v10 }
 0xf0d   :  { %951 = vtanh.f32 %v573_v12  ;;  %v636_v38 = vrot.slane %v573_v12, 7 }
 0xf13   :  { %v952_v14 = vpop.eup %951 }
 0xf14   :  { %576 = vrot.lane.b32.xlu0 %v952_v14, %s999_s4 }
 0xf86   :  { %v577_v15 = vpop.permute.xlu0 %576 }
 0xf87   :  { %v579_v16 = vmul.f32 %v577_v15, %v557_v7 }
 0xf89   :  { %v586_v17 = vrot.slane %v579_v16, 6 }
 0xf8b   :  { %587 = vrot.lane.b32.xlu1 %v586_v17, %s1000_s29 }
 0xffd   :  { %v588_v18 = vpop.permute.xlu1 %587 }
 0xffe   :  { %885 = vmatmul.msk.f32.vlgmr.msra.gmra.mxu0 %vm55_vm0, %v588_v18 }
0x107b   :  { %v608_v19 = vpop.f32.mrf.mxu0 }
0x107c   :  { %v612_v20 = vrot.slane %v608_v19, 1 }
0x107e   :  { %v614_v21 = vadd.f32 %v612_v20, %v1107_v13 }
0x1080   :  { %953 = vtanh.f32 %v614_v21  ;;  %v886_v24 = vmul.f32 -1.442695, %v614_v21 }
0x1082   :  { %955 = vpow2.f32 %v886_v24  ;;  %v783_v24 = vld [vmem:[%s1281_s10 + $0x50] sm:$0xff] }
0x1086   :  { %v954_v22 = vpop.eup %953 }
0x1087   :  { %640 = vrot.lane.b32.xlu2 %v954_v22, %s999_s4  ;;  %v784_v22 = vld [vmem:[%s1281_s10 + $0x58] sm:$0xff] }
0x1088   :  { %v956_v25 = vpop.eup %955  ;;  %794 = vmatpush.msrb.mxu3 %v784_v22 }
0x1089   :  { %v618_v26 = vadd.f32 1.0, %v956_v25 }
0x108a   :  { %795 = vmatpush.msrb.mxu3 %v783_v24 }
0x108b   :  { %957 = vrcp.f32 %v618_v26  ;;  %v630_v32 = vand.u32 2147483648, %v618_v26  ;;  %vm624_vm15 = vweird.f32 %v618_v26  ;;  %v628_v13 = vand.u32 2147483647, %v618_v26 }
0x108d   :  { %v631_v34 = vor.u32 1.1754944e-38, %v630_v32  ;;  %vm629_vm2 = vcmp.eq.f32.partialorder %v628_v13, 8.507059e+37  ;;  %v777_v13 = vld [vmem:[%s1281_s10 + $0x20] sm:$0xff] }
0x108f   :  { %431 = vrot.lane.b32.xlu2 %v1141_v23, %s1000_s29 }
0x1091   :  { %v958_v27 = vpop.eup %957 }
0x1092   :  { %v620_v28 = vmul.f32 %v958_v27, %v618_v26  ;;  %vm625_vm14 = vweird.f32 %v958_v27  ;;  %v782_v26 = vld [vmem:[%s1281_s10 + $0x48] sm:$0xff] }
0x1093   :  { %vm626_vm1 = vmor %vm624_vm15, %vm625_vm14  ;;  %796 = vmatpush.msrb.mxu3 %v782_v26 }
0x1094   :  { %v621_v29 = vsub.f32 1.0, %v620_v28  ;;  %v781_v28 = vld [vmem:[%s1281_s10 + $0x40] sm:$0xff] }
0x1095   :  { %797 = vmatpush.msrb.mxu3 %v781_v28 }
0x1096   :  { %v622_v30 = vmul.f32 %v958_v27, %v621_v29  ;;  %v780_v29 = vld [vmem:[%s1281_s10 + $0x38] sm:$0xff] }
0x1097   :  { %798 = vmatpush.msrb.mxu3 %v780_v29 }
0x1098   :  { %v623_v31 = vadd.f32 %v958_v27, %v622_v30  ;;  %v779_v30 = vld [vmem:[%s1281_s10 + $0x30] sm:$0xff] }
0x1099   :  { %799 = vmatpush.msrb.mxu3 %v779_v30 }
0x109a   :  { %v627_v33 = vsel %vm626_vm1, %v958_v27, %v623_v31  ;;  %v778_v31 = vld [vmem:[%s1281_s10 + $0x28] sm:$0xff] }
0x109b   :  { %v632_v23 = vsel %vm629_vm2, %v631_v34, %v627_v33  ;;  %800 = vmatpush.msrb.mxu3 %v778_v31  ;;  %v776_v34 = vld [vmem:[%s1281_s10 + $0x18] sm:$0xff] }
0x109c   :  { %v638_v39 = vmul.f32 %v636_v38, %v632_v23 }
0x109d   :  { %801 = vmatpush.msrb.mxu3 %v777_v13 }
0x109f   :  { %802 = vmatpush.msrb.mxu3 %v776_v34 }
0x10e1   :  { %v641_v35 = vpop.permute.xlu2 %640 }
0x10e2   :  { %v643_v36 = vmul.f32 %v641_v35, %v632_v23 }
0x10e4   :  { %645 = vrot.lane.b32.xlu0 %v643_v36, %s1000_s29 }
0x10e9   :  { %v432_v37 = vpop.permute.xlu2 %431 }
0x10ea   :  { %435 = vst.msk [vmem:[#allocation2 - $0x4] sm:$0x10] %vm434_vm3, %v432_v37 }
0x10ec   :  { %506 = vrot.lane.b32.xlu0 %v1150_v51, %s1000_s29  ;;  %v694_v51 = vld [vmem:[%s1278_s7] sm:$0xff] }
0x10ed   :  { %717 = vmatpush.msra.mxu2 %v694_v51  ;;  %v814_v51 = vld [vmem:[%s1282_s11 + $0x18] sm:$0xff]  ;;  %s1001_s11 = smov [#allocation4]  }
0x10ee   :  { %831 = vmatpush.msrb.mxu0 %v814_v51  ;;  %s858_s6 = sshll.u32 %s1001_s11, 4  ;;  %s859_s6 = int_to_ptr.vmem [resolvable:$true] %s858_s6 }
0x10f0   :  { %832 = vmatpush.msrb.mxu0 %v813_v52 }
0x10f2   :  { %833 = vmatpush.msrb.mxu0 %v812_v53 }
0x10f4   :  { %834 = vmatpush.msrb.mxu0 %v811_v54 }
0x1156   :  { %v646_v40 = vpop.permute.xlu0 %645 }
0x1157   :  { %v648_v41 = vadd.f32 %v646_v40, %v638_v39 }
0x1159   :  { %959 = vtanh.f32 %v648_v41 }
0x115e   :  { %v507_v42 = vpop.permute.xlu0 %506 }
0x115f   :  { %v960_v43 = vpop.eup %959  ;;  %510 = vst.msk [vmem:[#allocation2 - $0x4] sm:$0x20] %vm509_vm4, %v507_v42 }
0x1160   :  { %651 = vrot.lane.b32.xlu1 %v960_v43, %s999_s4 }
0x1168   :  { %581 = vrot.lane.b32.xlu1 %v579_v16, %s1000_s29 }
0x11d2   :  { %v652_v44 = vpop.permute.xlu1 %651 }
0x11d3   :  { %v654_v45 = vmul.f32 %v652_v44, %v632_v23  ;;  %v775_v23 = vld [vmem:[%s1281_s10 + $0x10] sm:$0xff]  ;;  %v774_v44 = vld [vmem:[%s1281_s10 + $0x8] sm:$0xff] }
0x11d4   :  { %803 = vmatpush.msrb.mxu3 %v775_v23 }
0x11d5   :  { %v669_v46 = vrot.slane %v654_v45, 7  ;;  %656 = vrot.lane.b32.xlu2 %v654_v45, %s1000_s29  ;;  %v773_v45 = vld [vmem:[%s1281_s10] sm:$0xff] }
0x11d6   :  { %804 = vmatpush.msrb.mxu3 %v774_v44 }
0x11d7   :  { %670 = vrot.lane.b32.xlu0 %v669_v46, %s1000_s29 }
0x11d8   :  { %805 = vmatpush.msrb.mxu3 %v773_v45 }
0x11da   :  { %v582_v47 = vpop.permute.xlu1 %581 }
0x11db   :  { %585 = vst.msk [vmem:[#allocation2 - $0x4] sm:$0x40] %vm584_vm5, %v582_v47 }
0x122f   :  { %v1196_v56 = vpop.permute.xlu2 %656 }
0x1230   :  { %660 = vst.msk [vmem:[#allocation2 - $0x4] sm:$0x80] %vm659_vm6, %v1196_v56 }
0x1237   :  { %v661_v57 = vld [vmem:[#allocation2] sm:$0xf] }
0x1238   :  { %v664_v58 = vld [vmem:[%s663_s1] sm:$0x1]  ;;  %888 = vmatmul.msk.f32.vlgmr.msra.gmra.mxu2 %vm55_vm0, %v661_v57 }
0x1239   :  { %v766_v59 = vrot.slane %v664_v58, 1 }
0x123b   :  { %767 = vrot.lane.b32.xlu0 %v766_v59, %s999_s4 }
0x1249   :  { %v671_v60 = vpop.permute.xlu0 %670 }
0x124a   :  { %887 = vmatmul.msk.f32.vlgmr.msrb.gmra.mxu1 %vm55_vm0, %v671_v60 }
0x12ad   :  { %v768_v47 = vpop.permute.xlu0 %767 }
0x12bb   :  { %v719_v63 = vpop.f32.mrf.mxu2 }
0x12c7   :  { %v691_v61 = vpop.f32.mrf.mxu1 }
0x12c8   :  { %v698_v62 = vperm.slane %v691_v61, 0 }
0x12ca   :  { %v720_v0 = vadd.f32 %v719_v63, %v698_v62 }
0x12cc   :  { %961 = vtanh.f32 %v720_v0 }
0x12d2   :  { %v962_v2 = vpop.eup %961 }
0x12d3   :  { %v727_v3 = vmul.f32 %v962_v2, %v896_v1 }
0x12d5   :  { %v729_v4 = vsel %vm728_vm7, %v727_v3, 0.0 }
0x12d6   :  { %730 = vadd.xlane.f32.xlu1 %v729_v4 }
0x1349   :  { %v731_v5 = vpop.xlane.xlu1 %730 }
0x134a   :  { %v733_v6 = vsel %vm732_vm8, %v731_v5, -inf }
0x134b   :  { %v734_v7 = vrot.slane %v733_v6, 4 }
0x134d   :  { %v735_v8 = vmax.f32 %v733_v6, %v734_v7 }
0x134f   :  { %v736_v9 = vrot.slane %v735_v8, 2 }
0x1351   :  { %v737_v10 = vmax.f32 %v735_v8, %v736_v9 }
0x1353   :  { %v738_v11 = vrot.slane %v737_v10, 1 }
0x1355   :  { %v739_v12 = vmax.f32 %v737_v10, %v738_v11 }
0x1357   :  { %v740_v14 = vsub.f32 %v731_v5, %v739_v12 }
0x1359   :  { %v741_v15 = vmul.f32 1.442695, %v740_v14 }
0x135b   :  { %963 = vpow2.f32 %v741_v15 }
0x1361   :  { %v964_v16 = vpop.eup %963 }
0x1362   :  { %v743_v17 = vsel %vm732_vm8, %v964_v16, 0.0 }
0x1363   :  { %v744_v18 = vrot.slane %v743_v17, 4 }
0x1365   :  { %v745_v19 = vadd.f32 %v744_v18, %v743_v17 }
0x1367   :  { %v746_v20 = vrot.slane %v745_v19, 2 }
0x1369   :  { %v747_v21 = vadd.f32 %v746_v20, %v745_v19 }
0x136b   :  { %v748_v25 = vrot.slane %v747_v21, 1 }
0x136d   :  { %v749_v27 = vadd.f32 %v748_v25, %v747_v21 }
0x136f   :  { %965 = vlog2.f32 %v749_v27 }
0x1375   :  { %v966_v32 = vpop.eup %965 }
0x1376   :  { %v751_v33 = vmul.f32 0.6931472, %v966_v32 }
0x1378   :  { %v752_v35 = vsub.f32 %v740_v14, %v751_v33 }
0x137a   :  { %v753_v36 = vmul.f32 %v752_v35, %v661_v57  ;;  %v815_v57 = vld [vmem:[%s1283_s12] sm:$0x1] }
0x137c   :  { %v754_v37 = vsel %vm728_vm7, %v753_v36, 0.0 }
0x137d   :  { %v755_v38 = vrot.slane %v754_v37, 4 }
0x137f   :  { %v756_v39 = vadd.f32 %v755_v38, %v754_v37 }
0x1381   :  { %v757_v40 = vrot.slane %v756_v39, 2 }
0x1383   :  { %v758_v41 = vadd.f32 %v757_v40, %v756_v39 }
0x1385   :  { %v759_v42 = vrot.slane %v758_v41, 1 }
0x1387   :  { %v760_v43 = vadd.f32 %v759_v42, %v758_v41 }
0x1389   :  { %762 = vrot.lane.b32.xlu2 %v760_v43, %s1000_s29 }
0x13e3   :  { %v763_v46 = vpop.permute.xlu2 %762 }
0x13e4   :  { %v770_v48 = vsel %vm55_vm0, %v1196_v56, %v763_v46 }
0x13e5   :  { %v772_v49 = vsel %vm771_vm9, %v770_v48, %v768_v47 }
0x13e6   :  { %v786_v50 = vrot.slane %v772_v49, 7 }
0x13e8   :  { %889 = vmatmul.msk.f32.vlgmr.msrb.gmra.mxu3 %vm787_vm10, %v786_v50 }
0x146b   :  { %v807_v55 = vpop.f32.mrf.mxu3 }
0x146c   :  { %967 = vtanh.f32 %v807_v55 }
0x1472   :  { %v968_v56 = vpop.eup %967 }
0x1473   :  { %890 = vmatmul.msk.f32.vlgmr.msrb.gmra.mxu0 %vm55_vm0, %v968_v56 }
0x14f0   :  { %v836_v58 = vpop.f32.mrf.mxu0 }
0x14f1   :  { %v837_v59 = vadd.f32 %v836_v58, %v815_v57 }
0x14f3   :  { %v840_v60 = vsel %vm839_vm11, %v837_v59, -inf }
0x14f4   :  { %841 = vmax.xlane.f32.xlu2 %v840_v60 }
0x1567   :  { %v842_v61 = vpop.xlane.xlu2 %841 }
0x1568   :  { %v843_v62 = vsub.f32 %v837_v59, %v842_v61 }
0x156a   :  { %v844_v63 = vmul.f32 1.442695, %v843_v62 }
0x156c   :  { %969 = vpow2.f32 %v844_v63 }
0x1572   :  { %v970_v0 = vpop.eup %969 }
0x1573   :  { %v846_v1 = vsel %vm839_vm11, %v970_v0, 0.0 }
0x1574   :  { %847 = vadd.xlane.f32.xlu0 %v846_v1 }
0x15e7   :  { %v848_v2 = vpop.xlane.xlu0 %847 }
0x15e8   :  { %971 = vlog2.f32 %v848_v2 }
0x15ee   :  { %v972_v3 = vpop.eup %971 }
0x15ef   :  { %v850_v4 = vmul.f32 0.6931472, %v972_v3 }
0x15f1   :  { %v851_v5 = vsub.f32 %v843_v62, %v850_v4 }
0x15f3   :  { %852 = vst.msk [vmem:[#allocation4] sm:$0x1] %vm839_vm11, %v851_v5 }
0x15f4   :  { %863 = dma.vmem_to_hbm [thread:$0]  %s859_s6, 16, %s861_s14, [#allocation5]  }
0x15f5   :  { %997 = dma.done.wait [#allocation5], 16  }
0x15f6   :  { %998 = vsyncadd [#allocation5], 4294967280 }
0x15f7   :  { %868 = vsyncpa [#allocation5], 1 }

</bundles_post_ra>
